<compile_context>
chip_gen: v5e
topology: v5e:2x2
jax: 0.10.0
libtpu: 0.0.40
codegen_flags: <defaults>
</compile_context>

<pallas_src>
import numpy as np
import jax
import jax.numpy as jnp
from jax import lax
from jax.experimental import pallas as pl
from jax.experimental.pallas import tpu as pltpu

H = W = 16          # input spatial size
CIN = 1
C1 = 4              # conv1 out channels
C2 = 8              # last_conv out channels
NUM_CLASSES = 2
POOLED = 8          # spatial size after 2x2 maxpool
LANE = 128          # fc output padded to one full lane tile
BT = 8              # images per grid step

K1_IN = 72          # stage-1 contraction: (dy:2) x (py:2) x (px:2) x (x':9)
K1_OUT = 128        # stage-1 output lanes: (parity q:4) x (c:4) x (x_out:8)
K2_IN = 96          # stage-2 contraction: (ky:3) x (ci:4) x (x_in:8)
K2_OUT = 64         # stage-2 output lanes: (co:8) x (x_out:8)


# --------------------------------------------------------------------------- band matrices
def _conv1_band(w1):
    """(72,128) band: folds conv1 taps + zero padding + pooling-parity selection into one dot.

    input lane  = dy*36 + py*18 + px*9 + x'   (parity planes of the padded image)
    output lane = q*32 + c*8 + x_out          (q = pooling parity, c = conv1 channel)
    """
    w1f = w1.reshape(C1, 9).astype(jnp.float32)                 # [c, ky*3+kx]
    in_l, out_l, ci_, ki_ = [], [], [], []
    for qy in range(2):
        for qx in range(2):
            q = qy * 2 + qx
            for c in range(C1):
                for xo in range(POOLED):
                    for ky in range(3):
                        for kx in range(3):
                            py, dy = (qy + ky) % 2, (qy + ky) // 2
                            px, dx = (qx + kx) % 2, (qx + kx) // 2
                            in_l.append(dy * 36 + py * 18 + px * 9 + (xo + dx))
                            out_l.append(q * 32 + c * 8 + xo)
                            ci_.append(c)
                            ki_.append(ky * 3 + kx)
    vals = w1f[np.asarray(ci_), np.asarray(ki_)]
    band = jnp.zeros((K1_IN, K1_OUT), jnp.float32)
    return band.at[np.asarray(in_l), np.asarray(out_l)].set(vals)


def _conv2_band(w2):
    """(96,64) band: folds last_conv taps + x-direction zero padding into one dot.

    input lane  = ky*32 + ci*8 + x_in      (row-shifted pooled map, lanes = (ci, x))
    output lane = co*8 + x_out
    """
    w2f = w2.reshape(-1).astype(jnp.float32)
    in_l, out_l, wi = [], [], []
    for ky in range(3):
        for ci in range(C1):
            for xin in range(POOLED):
                for xo in range(POOLED):
                    kx = xin - xo + 1
                    if 0 <= kx <= 2:
                        for co in range(C2):
                            in_l.append(ky * 32 + ci * 8 + xin)
                            out_l.append(co * 8 + xo)
                            wi.append(((co * C1 + ci) * 3 + ky) * 3 + kx)
    vals = w2f[np.asarray(wi)]
    band = jnp.zeros((K2_IN, K2_OUT), jnp.float32)
    return band.at[np.asarray(in_l), np.asarray(out_l)].set(vals)


# --------------------------------------------------------------------------- fused kernel
def _fused_kernel(xq_ref, w1_ref, b1_ref, w2_ref, b2_ref, wh_ref, bh_ref, o_ref):
    bt = xq_ref.shape[0]
    xq = xq_ref[...]                                            # (bt, 9, 36) parity planes

    # ---- stage 1: conv1 for all 4 pooling parities in ONE banded MXU dot, then maxpool
    lhs1 = jnp.concatenate([xq[:, 0:8, :], xq[:, 1:9, :]], axis=2)       # (bt, 8, 72)
    y1 = jnp.dot(lhs1.reshape(bt * 8, K1_IN), w1_ref[...],
                 preferred_element_type=jnp.float32)                      # (bt*8, 128)
    m = jnp.maximum(jnp.maximum(y1[:, 0:32], y1[:, 32:64]),
                    jnp.maximum(y1[:, 64:96], y1[:, 96:128]))             # maxpool over parity
    pooled = jnp.maximum(m + b1_ref[...], 0.0)                            # (bt*8, 32) = (b,y) x (c,x)

    # ---- stage 2: last_conv as ONE banded MXU dot (pooled map never leaves vregs)
    pr = pooled.reshape(bt, 8, 32)
    z = jnp.zeros((bt, 1, 32), jnp.float32)
    prp = jnp.concatenate([z, pr, z], axis=1)                             # (bt, 10, 32), y-padded
    lhs2 = jnp.concatenate([prp[:, 0:8, :], prp[:, 1:9, :], prp[:, 2:10, :]],
                           axis=2)                                        # (bt, 8, 96)
    y2 = jnp.dot(lhs2.reshape(bt * 8, K2_IN), w2_ref[...],
                 preferred_element_type=jnp.float32)                      # (bt*8, 64)
    a2 = jnp.maximum(y2 + b2_ref[...], 0.0)

    # ---- head: AdaptiveAvgPool(1,1) + fc folded into one dot (output padded to 128 lanes)
    s = jnp.sum(a2.reshape(bt, 8, K2_OUT), axis=1)                        # (bt, 64), sum over y
    o_ref[...] = jnp.dot(s, wh_ref[...],
                         preferred_element_type=jnp.float32) + bh_ref[...]


# --------------------------------------------------------------------------- wrapper
def mock_model_forward(x_nchw, params):
    w1, b1, w2, b2, wf, bf = params              # PyTorch layouts: conv OIHW, linear (out,in)
    B = x_nchw.shape[0]
    n_steps = max(2, pl.cdiv(B, BT))             # >= 2 steps so v7x uses both TensorCores
    Bpad = n_steps * BT

    # parity regrouping of the zero-padded input: (B,18,18) -> (Bpad,9,36),
    # lane = py*18 + px*9 + x'  (size-preserving, ~1.3 KB/image; NO 9-tap im2col in HBM)
    x = x_nchw.reshape(B, H, W).astype(jnp.float32)
    xp = jnp.pad(x, ((0, Bpad - B), (1, 1), (1, 1)))
    xq = xp.reshape(Bpad, 9, 2, 9, 2).transpose(0, 1, 2, 4, 3).reshape(Bpad, 9, 36)

    # precompute band matrices / lane-tiled biases (tiny, one-time)
    w1band = _conv1_band(w1)                                              # (72, 128)
    b1t = jnp.repeat(b1.astype(jnp.float32), POOLED).reshape(1, 32)       # lane = c*8+x
    w2band = _conv2_band(w2)                                              # (96, 64)
    b2t = jnp.repeat(b2.astype(jnp.float32), POOLED).reshape(1, 64)       # lane = co*8+x
    whead = jnp.pad(jnp.repeat(wf.T.astype(jnp.float32) * (1.0 / 64.0), POOLED, axis=0),
                    ((0, 0), (0, LANE - NUM_CLASSES)))                    # (64, 128)
    bhead = jnp.pad(bf.astype(jnp.float32).reshape(1, NUM_CLASSES),
                    ((0, 0), (0, LANE - NUM_CLASSES)))                    # (1, 128)

    flops = int(Bpad * (2 * 8 * K1_IN * K1_OUT + 2 * 8 * K2_IN * K2_OUT + 2 * K2_OUT * LANE))
    bytes_accessed = int(4 * (Bpad * (9 * 36 + LANE)
                              + K1_IN * K1_OUT + 32 + K2_IN * K2_OUT + 64 + 64 * LANE + LANE))

    out = pl.pallas_call(
        _fused_kernel,
        out_shape=jax.ShapeDtypeStruct((Bpad, LANE), jnp.float32),
        grid=(Bpad // BT,),
        in_specs=[
            pl.BlockSpec((BT, 9, 36), lambda i: (i, 0, 0)),      # parity-plane input block
            pl.BlockSpec((K1_IN, K1_OUT), lambda i: (0, 0)),     # conv1 band
            pl.BlockSpec((1, 32), lambda i: (0, 0)),             # conv1 bias (lane-tiled)
            pl.BlockSpec((K2_IN, K2_OUT), lambda i: (0, 0)),     # last_conv band
            pl.BlockSpec((1, 64), lambda i: (0, 0)),             # last_conv bias (lane-tiled)
            pl.BlockSpec((K2_OUT, LANE), lambda i: (0, 0)),      # avgpool+fc weight (padded)
            pl.BlockSpec((1, LANE), lambda i: (0, 0)),           # fc bias (padded)
        ],
        out_specs=pl.BlockSpec((BT, LANE), lambda i: (i, 0)),
        compiler_params=pltpu.CompilerParams(dimension_semantics=("parallel",)),
        cost_estimate=pl.CostEstimate(flops=flops, transcendentals=0,
                                      bytes_accessed=bytes_accessed),
    )(xq, w1band, b1t, w2band, b2t, whead, bhead)

    return out[:B, :NUM_CLASSES]


# --------------------------------------------------------------------------- pure-JAX reference
def reference_forward(x_nchw, params):
    w1, b1, w2, b2, wf, bf = params
    dn = ("NCHW", "OIHW", "NCHW")
    y = lax.conv_general_dilated(x_nchw, w1, (1, 1), ((1, 1), (1, 1)),
                                 dimension_numbers=dn, precision=lax.Precision.HIGHEST)
    y = jnp.maximum(y + b1.reshape(1, -1, 1, 1), 0.0)
    y = lax.reduce_window(y, -jnp.inf, lax.max, (1, 1, 2, 2), (1, 1, 2, 2), "VALID")
    y = lax.conv_general_dilated(y, w2, (1, 1), ((1, 1), (1, 1)),
                                 dimension_numbers=dn, precision=lax.Precision.HIGHEST)
    y = jnp.maximum(y + b2.reshape(1, -1, 1, 1), 0.0)
    y = jnp.mean(y, axis=(2, 3))                                          # (B, 8)
    return y @ wf.T + bf


# --------------------------------------------------------------------------- main
if __name__ == "__main__":
    key = jax.random.PRNGKey(0)
    k1, k2, k3, k4, k5, k6, kx = jax.random.split(key, 7)

    # deterministic parameter init (PyTorch layouts: conv OIHW, linear (out, in))
    w1 = jax.random.normal(k1, (C1, CIN, 3, 3), jnp.float32) * 0.2
    b1 = jax.random.normal(k2, (C1,), jnp.float32) * 0.1
    w2 = jax.random.normal(k3, (C2, C1, 3, 3), jnp.float32) * 0.2
    b2 = jax.random.normal(k4, (C2,), jnp.float32) * 0.1
    wf = jax.random.normal(k5, (NUM_CLASSES, C2), jnp.float32) * 0.2
    bf = jax.random.normal(k6, (NUM_CLASSES,), jnp.float32) * 0.1
    params = (w1, b1, w2, b2, wf, bf)

    B = 16                                                      # 2 grid steps of 8 images
    x = jax.random.normal(kx, (B, CIN, H, W), jnp.float32)      # NCHW like PyTorch

    out = jax.jit(mock_model_forward)(x, params)
    out = jax.block_until_ready(out)

    ref = jax.block_until_ready(reference_forward(x, params))
    assert out.shape == (B, NUM_CLASSES), out.shape
    assert jnp.allclose(out, ref, atol=1e-2, rtol=1e-2), (out, ref)

    print("KERNEL_OK")
</pallas_src>

<mosaic_0001>
module attributes {stable_mosaic.version = 11 : i64} {
  func.func @_fused_kernel(%arg0: i32, %arg1: memref<8x9x36xf32, #tpu.memory_space<vmem>>, %arg2: memref<72x128xf32, #tpu.memory_space<vmem>>, %arg3: memref<1x32xf32, #tpu.memory_space<vmem>>, %arg4: memref<96x64xf32, #tpu.memory_space<vmem>>, %arg5: memref<1x64xf32, #tpu.memory_space<vmem>>, %arg6: memref<64x128xf32, #tpu.memory_space<vmem>>, %arg7: memref<1x128xf32, #tpu.memory_space<vmem>>, %arg8: memref<8x128xf32, #tpu.memory_space<vmem>>) attributes {dimension_semantics = [#tpu.dimension_semantics<parallel>], iteration_bounds = array<i64: 2>, scalar_prefetch = 0 : i64, scratch_operands = 0 : i64, tpu.core_type = #tpu.core_type<tc>, window_params = [{transform_indices = @transform_0, window_bounds = array<i64: 8, 9, 36>}, {pipeline_mode = #tpu.pipeline_mode<synchronous>, transform_indices = @transform_1, window_bounds = array<i64: 72, 128>}, {pipeline_mode = #tpu.pipeline_mode<synchronous>, transform_indices = @transform_2, window_bounds = array<i64: 1, 32>}, {pipeline_mode = #tpu.pipeline_mode<synchronous>, transform_indices = @transform_3, window_bounds = array<i64: 96, 64>}, {pipeline_mode = #tpu.pipeline_mode<synchronous>, transform_indices = @transform_4, window_bounds = array<i64: 1, 64>}, {pipeline_mode = #tpu.pipeline_mode<synchronous>, transform_indices = @transform_5, window_bounds = array<i64: 64, 128>}, {pipeline_mode = #tpu.pipeline_mode<synchronous>, transform_indices = @transform_6, window_bounds = array<i64: 1, 128>}, {transform_indices = @transform_7, window_bounds = array<i64: 8, 128>}]} {
    %c0 = arith.constant 0 : index
    %c0_0 = arith.constant 0 : index
    %c0_1 = arith.constant 0 : index
    %0 = vector.load %arg1[%c0, %c0_0, %c0_1] : memref<8x9x36xf32, #tpu.memory_space<vmem>>, vector<8x9x36xf32>
    %1 = vector.extract_strided_slice %0 {offsets = [0, 0, 0], sizes = [8, 8, 36], strides = [1, 1, 1]} : vector<8x9x36xf32> to vector<8x8x36xf32>
    %2 = vector.extract_strided_slice %0 {offsets = [0, 1, 0], sizes = [8, 8, 36], strides = [1, 1, 1]} : vector<8x9x36xf32> to vector<8x8x36xf32>
    %3 = tpu.concatenate %1, %2 in 2 : vector<8x8x36xf32>, vector<8x8x36xf32> -> vector<8x8x72xf32>
    %4 = vector.shape_cast %3 : vector<8x8x72xf32> to vector<64x72xf32>
    %c0_2 = arith.constant 0 : index
    %c0_3 = arith.constant 0 : index
    %5 = vector.load %arg2[%c0_2, %c0_3] : memref<72x128xf32, #tpu.memory_space<vmem>>, vector<72x128xf32>
    %cst = arith.constant dense<0.000000e+00> : vector<64x128xf32>
    %6 = tpu.matmul %4, %5, %cst {dimension_numbers = #tpu.dot_dimension_numbers<[1], [0], [0], [1], [0, 0, 1, 1], [], []>} : vector<64x72xf32>, vector<72x128xf32>, vector<64x128xf32> -> vector<64x128xf32>
    %7 = vector.extract_strided_slice %6 {offsets = [0, 0], sizes = [64, 32], strides = [1, 1]} : vector<64x128xf32> to vector<64x32xf32>
    %8 = vector.extract_strided_slice %6 {offsets = [0, 32], sizes = [64, 32], strides = [1, 1]} : vector<64x128xf32> to vector<64x32xf32>
    %9 = arith.maximumf %7, %8 : vector<64x32xf32>
    %10 = vector.extract_strided_slice %6 {offsets = [0, 64], sizes = [64, 32], strides = [1, 1]} : vector<64x128xf32> to vector<64x32xf32>
    %11 = vector.extract_strided_slice %6 {offsets = [0, 96], sizes = [64, 32], strides = [1, 1]} : vector<64x128xf32> to vector<64x32xf32>
    %12 = arith.maximumf %10, %11 : vector<64x32xf32>
    %13 = arith.maximumf %9, %12 : vector<64x32xf32>
    %c0_4 = arith.constant 0 : index
    %c0_5 = arith.constant 0 : index
    %14 = vector.load %arg3[%c0_4, %c0_5] : memref<1x32xf32, #tpu.memory_space<vmem>>, vector<1x32xf32>
    %15 = vector.broadcast %14 : vector<1x32xf32> to vector<64x32xf32>
    %16 = arith.addf %13, %15 : vector<64x32xf32>
    %cst_6 = arith.constant 0.000000e+00 : f32
    %17 = vector.broadcast %cst_6 : f32 to vector<64x32xf32>
    %18 = arith.maximumf %16, %17 : vector<64x32xf32>
    %19 = vector.shape_cast %18 : vector<64x32xf32> to vector<8x8x32xf32>
    %cst_7 = arith.constant 0.000000e+00 : f32
    %20 = vector.broadcast %cst_7 : f32 to vector<8x1x32xf32>
    %21 = tpu.concatenate %20, %19, %20 in 1 : vector<8x1x32xf32>, vector<8x8x32xf32>, vector<8x1x32xf32> -> vector<8x10x32xf32>
    %22 = vector.extract_strided_slice %21 {offsets = [0, 0, 0], sizes = [8, 8, 32], strides = [1, 1, 1]} : vector<8x10x32xf32> to vector<8x8x32xf32>
    %23 = vector.extract_strided_slice %21 {offsets = [0, 1, 0], sizes = [8, 8, 32], strides = [1, 1, 1]} : vector<8x10x32xf32> to vector<8x8x32xf32>
    %24 = vector.extract_strided_slice %21 {offsets = [0, 2, 0], sizes = [8, 8, 32], strides = [1, 1, 1]} : vector<8x10x32xf32> to vector<8x8x32xf32>
    %25 = tpu.concatenate %22, %23, %24 in 2 : vector<8x8x32xf32>, vector<8x8x32xf32>, vector<8x8x32xf32> -> vector<8x8x96xf32>
    %26 = vector.shape_cast %25 : vector<8x8x96xf32> to vector<64x96xf32>
    %c0_8 = arith.constant 0 : index
    %c0_9 = arith.constant 0 : index
    %27 = vector.load %arg4[%c0_8, %c0_9] : memref<96x64xf32, #tpu.memory_space<vmem>>, vector<96x64xf32>
    %cst_10 = arith.constant dense<0.000000e+00> : vector<64x64xf32>
    %28 = tpu.matmul %26, %27, %cst_10 {dimension_numbers = #tpu.dot_dimension_numbers<[1], [0], [0], [1], [0, 0, 1, 1], [], []>} : vector<64x96xf32>, vector<96x64xf32>, vector<64x64xf32> -> vector<64x64xf32>
    %c0_11 = arith.constant 0 : index
    %c0_12 = arith.constant 0 : index
    %29 = vector.load %arg5[%c0_11, %c0_12] : memref<1x64xf32, #tpu.memory_space<vmem>>, vector<1x64xf32>
    %30 = vector.broadcast %29 : vector<1x64xf32> to vector<64x64xf32>
    %31 = arith.addf %28, %30 : vector<64x64xf32>
    %cst_13 = arith.constant 0.000000e+00 : f32
    %32 = vector.broadcast %cst_13 : f32 to vector<64x64xf32>
    %33 = arith.maximumf %31, %32 : vector<64x64xf32>
    %34 = vector.shape_cast %33 : vector<64x64xf32> to vector<8x8x64xf32>
    %cst_14 = arith.constant dense<0.000000e+00> : vector<8x64xf32>
    %35 = vector.multi_reduction <add>, %34, %cst_14 [1] : vector<8x8x64xf32> to vector<8x64xf32>
    %c0_15 = arith.constant 0 : index
    %c0_16 = arith.constant 0 : index
    %36 = vector.load %arg6[%c0_15, %c0_16] : memref<64x128xf32, #tpu.memory_space<vmem>>, vector<64x128xf32>
    %cst_17 = arith.constant dense<0.000000e+00> : vector<8x128xf32>
    %37 = tpu.matmul %35, %36, %cst_17 {dimension_numbers = #tpu.dot_dimension_numbers<[1], [0], [0], [1], [0, 0, 1, 1], [], []>} : vector<8x64xf32>, vector<64x128xf32>, vector<8x128xf32> -> vector<8x128xf32>
    %c0_18 = arith.constant 0 : index
    %c0_19 = arith.constant 0 : index
    %38 = vector.load %arg7[%c0_18, %c0_19] : memref<1x128xf32, #tpu.memory_space<vmem>>, vector<1x128xf32>
    %39 = vector.broadcast %38 : vector<1x128xf32> to vector<8x128xf32>
    %40 = arith.addf %37, %39 : vector<8x128xf32>
    %c0_20 = arith.constant 0 : index
    %c0_21 = arith.constant 0 : index
    %41 = vector.load %arg8[%c0_20, %c0_21] : memref<8x128xf32, #tpu.memory_space<vmem>>, vector<8x128xf32>
    tpu.vector_store %arg8[%c0_20, %c0_21], %40 {strides = array<i32>} : memref<8x128xf32, #tpu.memory_space<vmem>>, vector<8x128xf32>,
    return
  }
  func.func @transform_0(%arg0: i32) -> (i32, i32, i32) {
    %c0_i32 = arith.constant 0 : i32
    %c0_i32_0 = arith.constant 0 : i32
    %c0_i32_1 = arith.constant 0 : i32
    return %arg0, %c0_i32, %c0_i32_0 : i32, i32, i32
  }
  func.func @transform_1(%arg0: i32) -> (i32, i32) {
    %c0_i32 = arith.constant 0 : i32
    %c0_i32_0 = arith.constant 0 : i32
    %c0_i32_1 = arith.constant 0 : i32
    return %c0_i32, %c0_i32_0 : i32, i32
  }
  func.func @transform_2(%arg0: i32) -> (i32, i32) {
    %c0_i32 = arith.constant 0 : i32
    %c0_i32_0 = arith.constant 0 : i32
    %c0_i32_1 = arith.constant 0 : i32
    return %c0_i32, %c0_i32_0 : i32, i32
  }
  func.func @transform_3(%arg0: i32) -> (i32, i32) {
    %c0_i32 = arith.constant 0 : i32
    %c0_i32_0 = arith.constant 0 : i32
    %c0_i32_1 = arith.constant 0 : i32
    return %c0_i32, %c0_i32_0 : i32, i32
  }
  func.func @transform_4(%arg0: i32) -> (i32, i32) {
    %c0_i32 = arith.constant 0 : i32
    %c0_i32_0 = arith.constant 0 : i32
    %c0_i32_1 = arith.constant 0 : i32
    return %c0_i32, %c0_i32_0 : i32, i32
  }
  func.func @transform_5(%arg0: i32) -> (i32, i32) {
    %c0_i32 = arith.constant 0 : i32
    %c0_i32_0 = arith.constant 0 : i32
    %c0_i32_1 = arith.constant 0 : i32
    return %c0_i32, %c0_i32_0 : i32, i32
  }
  func.func @transform_6(%arg0: i32) -> (i32, i32) {
    %c0_i32 = arith.constant 0 : i32
    %c0_i32_0 = arith.constant 0 : i32
    %c0_i32_1 = arith.constant 0 : i32
    return %c0_i32, %c0_i32_0 : i32, i32
  }
  func.func @transform_7(%arg0: i32) -> (i32, i32) {
    %c0_i32 = arith.constant 0 : i32
    %c0_i32_0 = arith.constant 0 : i32
    return %arg0, %c0_i32 : i32, i32
  }
}

</mosaic_0001>

<bundles_post_ra>
// kernel: mock_model_forward.1
= control target key start
LH: loop header
LB: loop body
LE: loop exit
PB: predicated region body
PF: predicated region fallthrough
CT: control target
= control target key end

     0   :  { %s1092_s24 = smov 0   ;;  %s1435_s0 = inlined_call_operand.vmem [shape: f32[16,9,36], index: 0, kind: input, shape index: {}]   ;;  %s1436_s1 = inlined_call_operand.vmem [shape: f32[72,128], index: 1, kind: input, shape index: {}]   ;;  %s1437_s2 = inlined_call_operand.vmem [shape: f32[1,32], index: 2, kind: input, shape index: {}]   ;;  %s1438_s3 = inlined_call_operand.vmem [shape: f32[96,64], index: 3, kind: input, shape index: {}]   ;;  %s1439_s4 = inlined_call_operand.vmem [shape: f32[1,64], index: 4, kind: input, shape index: {}]   ;;  %s1440_s5 = inlined_call_operand.vmem [shape: f32[64,128], index: 5, kind: input, shape index: {}]   ;;  %s1441_s6 = inlined_call_operand.vmem [shape: f32[1,128], index: 6, kind: input, shape index: {}]   ;;  %s1442_s7 = inlined_call_operand.vmem [shape: f32[16,128], index: 7, kind: output, shape index: {}]  }
   0x1 LB: > { %s1098_s25 = sadd.s32 4294967295, %s1046_s24   ;;  %p979_p0 = scmp.ge.s32.totalorder %s1046_s24, 1  ;;  %s1046_s24 = sphi %s1092_s24, %s17_s24  }
   0x2   : > { %p239_p1 = scmp.lt.s32.totalorder %s1046_s24, 3 }
   0x4   : > { %p240_p2 = pnand %p979_p0, %p239_p1 }
   0x5   : > { %s980_s26 = sshll.u32 (!%p240_p2), %s1098_s25, 3  ;;  %s1048_s16 = smov (!%p240_p2), 36  }
   0x6   : > { %243 = sbr.rel (%p240_p2) target bundleno = 944 (0x3b0), region = 48  ;;  %p272_p3 = scmp.lt.s32.totalorder (!%p240_p2), %s980_s26, 15 }
   0x7   : > { %s1049_s29 = smov (!%p240_p2), 96   ;;  %s1050_s30 = smov (!%p240_p2), 64  }
   0x8   : > { %s1051_s10 = smov (!%p240_p2), 32   ;;  %p278_p4 = scmp.lt.s32.totalorder (!%p240_p2), %s1098_s25, 1 }
   0xb   : > { %v380_v0 = vld [vmem:[%s1436_s1 + $0x40] sm:$0xff]  ;;  %v379_v1 = vld [vmem:[%s1436_s1 + $0x38] sm:$0xff]  ;;  %v378_v2 = vld [vmem:[%s1436_s1 + $0x30] sm:$0xff]  ;;  %s1444_s26 = smov (!%p272_p3, %s980_s26), 15  ;;  %vm314_vm0 = vcmask 1046528   ;;  %vm363_vm1 = vcmask 293888  }
   0xc   : > { %1004 = vmatpush.msra.mxu2 %v380_v0  ;;  %413 = vmatpush.msra.mxu0 %v380_v0  ;;  %v377_v3 = vld [vmem:[%s1436_s1 + $0x28] sm:$0xff]  ;;  %s1003_s12 = sshll.u32 %s1444_s26, 4  ;;  %v376_v44 = vld [vmem:[%s1436_s1 + $0x20] sm:$0xff]  ;;  %v375_v45 = vld [vmem:[%s1436_s1 + $0x18] sm:$0xff]  ;;  %vm381_vm2 = vcmask 588800   ;;  %vm571_vm3 = vcmask 1040384  }
   0xd   : > { %s1118_s15 = scalar_lea.vmem %s1435_s0, %s1003_s12  ;;  %v374_v46 = vld [vmem:[%s1436_s1 + $0x10] sm:$0xff]  ;;  %v373_v47 = vld [vmem:[%s1436_s1 + $0x8] sm:$0xff]  ;;  %v372_v48 = vld [vmem:[%s1436_s1] sm:$0xff]  ;;  %vm652_vm4 = vcmask 1045504   ;;  %vm701_vm5 = vcmask 261120   ;;  %vm710_vm6 = vcmask 523264  }
   0xe   : > { %1005 = vmatpush.msra.mxu2 %v379_v1  ;;  %414 = vmatpush.msra.mxu0 %v379_v1  ;;  %v1121_v4 = vld [vmem:[%s1118_s15 + $0x40] sm:$0xff]  ;;  %v291_v5 = vld [vmem:[%s1118_s15 + $0x48] sm:$0x1]  ;;  %v292_v12 = vld [vmem:[%s1118_s15 + $0x50] sm:$0xff]  ;;  %vm735_vm7 = vcmask 785408   ;;  %vm885_vm8 = vcmask 1041409  }
   0xf   : > { %v1125_v6 = vld [vmem:[%s1118_s15] sm:$0xff]  ;;  %v327_v7 = vrot.slane %v1121_v4, 1  ;;  %v328_v8 = vrot.slane %v291_v5, 1  ;;  %v283_v9 = vld [vmem:[%s1118_s15 + $0x8] sm:$0x1]  ;;  %v1137_v16 = vld [vmem:[%s1118_s15 + $0x10] sm:$0xff] }
  0x10   : > { %1006 = vmatpush.msra.mxu2 %v378_v2  ;;  %415 = vmatpush.msra.mxu0 %v378_v2  ;;  %v315_v10 = vrot.slane %v1125_v6, 1  ;;  %v316_v11 = vrot.slane %v283_v9, 1  ;;  %v293_v13 = vld [vmem:[%s1118_s15 + $0x58] sm:$0x1]  ;;  %v1133_v14 = vld [vmem:[%s1118_s15 + $0x20] sm:$0xff]  ;;  %v330_v22 = vrot.slane %v292_v12, 1 }
  0x11   : > { %v329_v15 = vsel %vm314_vm0, %v327_v7, %v328_v8  ;;  %v285_v17 = vld [vmem:[%s1118_s15 + $0x18] sm:$0x1]  ;;  %v287_v18 = vld [vmem:[%s1118_s15 + $0x28] sm:$0x1]  ;;  %v321_v20 = vrot.slane %v1133_v14, 1  ;;  %v331_v23 = vrot.slane %v293_v13, 1 }
  0x12   : > { %1007 = vmatpush.msra.mxu2 %v377_v3  ;;  %416 = vmatpush.msra.mxu0 %v377_v3  ;;  %v317_v19 = vsel %vm314_vm0, %v315_v10, %v316_v11  ;;  %v322_v21 = vrot.slane %v287_v18, 1  ;;  %v288_v24 = vld [vmem:[%s1118_s15 + $0x30] sm:$0xff]  ;;  %v289_v25 = vld [vmem:[%s1118_s15 + $0x38] sm:$0x1]  ;;  %v318_v26 = vrot.slane %v1137_v16, 1  ;;  %v319_v27 = vrot.slane %v285_v17, 1 }
  0x13   : > { %347 = vrot.lane.b32.xlu2 %v329_v15, %s1048_s16  ;;  %339 = vrot.lane.b32.xlu0 %v317_v19, %s1048_s16  ;;  %v324_v29 = vrot.slane %v288_v24, 1  ;;  %v325_v30 = vrot.slane %v289_v25, 1  ;;  %v332_v31 = vsel %vm314_vm0, %v330_v22, %v331_v23  ;;  %v294_v33 = vld [vmem:[%s1118_s15 + $0x60] sm:$0xff]  ;;  %v295_v34 = vld [vmem:[%s1118_s15 + $0x68] sm:$0x1]  ;;  %vm887_vm9 = vcmask 1042434  }
  0x14   : > { %v323_v28 = vsel %vm314_vm0, %v321_v20, %v322_v21  ;;  %v320_v32 = vsel %vm314_vm0, %v318_v26, %v319_v27  ;;  %v296_v36 = vld [vmem:[%s1118_s15 + $0x70] sm:$0xff]  ;;  %v297_v37 = vld [vmem:[%s1118_s15 + $0x78] sm:$0x1]  ;;  %v333_v38 = vrot.slane %v294_v33, 1  ;;  %v334_v39 = vrot.slane %v295_v34, 1  ;;  %1008 = vmatpush.msra.mxu2 %v376_v44  ;;  %417 = vmatpush.msra.mxu0 %v376_v44  ;;  %s1446_s25 = smov (!%p278_p4, %s1098_s25), 1 }
  0x15   : > { %343 = vrot.lane.b32.xlu1 %v323_v28, %s1048_s16  ;;  %v326_v35 = vsel %vm314_vm0, %v324_v29, %v325_v30  ;;  %v336_v40 = vrot.slane %v296_v36, 1  ;;  %v337_v41 = vrot.slane %v297_v37, 1  ;;  %v1222_v25 = vld [vmem:[%s1437_s2] ss:$0 sm:$0xff]  ;;  %vm889_vm10 = vcmask 1043459   ;;  %s983_s11 = sshll.u32 %s1446_s25, 3 }
  0x16   : > { %v335_v42 = vsel %vm314_vm0, %v333_v38, %v334_v39  ;;  %1009 = vmatpush.msra.mxu2 %v375_v45  ;;  %418 = vmatpush.msra.mxu0 %v375_v45  ;;  %vm891_vm11 = vcmask 1044484   ;;  %vm893_vm12 = vcmask 1045509   ;;  %vm895_vm13 = vcmask 1046534  }
  0x17   : > { %v338_v43 = vsel %vm314_vm0, %v336_v40, %v337_v41  ;;  %vm897_vm14 = vcmask 1047559  }
  0x18   : > { %1010 = vmatpush.msra.mxu2 %v374_v46  ;;  %419 = vmatpush.msra.mxu0 %v374_v46 }
  0x1a   : > { %1011 = vmatpush.msra.mxu2 %v373_v47  ;;  %420 = vmatpush.msra.mxu0 %v373_v47 }
  0x1b   : > { %349 = vrot.lane.b32.xlu2 %v332_v31, %s1048_s16  ;;  %341 = vrot.lane.b32.xlu0 %v320_v32, %s1048_s16 }
  0x1c   : > { %1012 = vmatpush.msra.mxu2 %v372_v48  ;;  %421 = vmatpush.msra.mxu0 %v372_v48 }
  0x1d   : > { %345 = vrot.lane.b32.xlu1 %v326_v35, %s1048_s16 }
  0x23   : > { %351 = vrot.lane.b32.xlu0 %v335_v42, %s1048_s16 }
  0x25   : > { %353 = vrot.lane.b32.xlu1 %v338_v43, %s1048_s16  ;;  %s281_s16 = scalar_lea.vmem %s1442_s7, %s983_s11 }
  0x6d   : > { %v348_v49 = vpop.permute.xlu2 %347 }
  0x6e   : > { %v368_v0 = vsel %vm363_vm1, %v1121_v4, %v348_v49 }
  0x75   : > { %v350_v50 = vpop.permute.xlu2 %349 }
  0x76   : > { %v369_v51 = vsel %vm363_vm1, %v292_v12, %v350_v50 }
  0x77   : > { %989 = vmatmul.msk.f32.vlgmr.msra.gmra.mxu2 %vm381_vm2, %v369_v51 }
  0x85   : > { %v340_v52 = vpop.permute.xlu0 %339 }
  0x86   : > { %v364_v53 = vsel %vm363_vm1, %v1125_v6, %v340_v52 }
  0x87   : > { %984 = vmatmul.msk.f32.vlgmr.msra.gmra.mxu0 %vm381_vm2, %v364_v53  ;;  %v344_v54 = vpop.permute.xlu1 %343 }
  0x88   : > { %v366_v58 = vsel %vm363_vm1, %v1133_v14, %v344_v54 }
  0x8d   : > { %v342_v55 = vpop.permute.xlu0 %341 }
  0x8e   : > { %v365_v56 = vsel %vm363_vm1, %v1137_v16, %v342_v55 }
  0x8f   : > { %985 = vmatmul.msk.f32.gmra.mxu0 %vm381_vm2, %v365_v56  ;;  %v346_v57 = vpop.permute.xlu1 %345 }
  0x90   : > { %v367_v62 = vsel %vm363_vm1, %v288_v24, %v346_v57 }
  0x95   : > { %v352_v59 = vpop.permute.xlu0 %351 }
  0x96   : > { %v370_v60 = vsel %vm363_vm1, %v294_v33, %v352_v59 }
  0x97   : > { %986 = vmatmul.msk.f32.gmra.mxu0 %vm381_vm2, %v366_v58  ;;  %990 = vmatmul.msk.f32.gmra.mxu2 %vm381_vm2, %v370_v60  ;;  %v354_v61 = vpop.permute.xlu1 %353 }
  0x98   : > { %v371_v63 = vsel %vm363_vm1, %v296_v36, %v354_v61 }
  0x9f   : > { %987 = vmatmul.msk.f32.gmra.mxu0 %vm381_vm2, %v367_v62  ;;  %991 = vmatmul.msk.f32.gmra.mxu2 %vm381_vm2, %v371_v63 }
  0xa7   : > { %988 = vmatmul.msk.f32.gmra.mxu0 %vm381_vm2, %v368_v0 }
  0xfa   : > { %v438_v1 = vpop.f32.mrf.mxu2 }
  0xfb   : > { %465 = vrot.lane.b32.xlu1 %v438_v1, %s1049_s29 }
 0x104   : > { %v423_v2 = vpop.f32.mrf.mxu0 }
 0x105   : > { %455 = vrot.lane.b32.xlu0 %v423_v2, %s1049_s29 }
 0x10c   : > { %v426_v3 = vpop.f32.mrf.mxu0 }
 0x114   : > { %v429_v5 = vpop.f32.mrf.mxu0 }
 0x115   : > { %459 = vrot.lane.b32.xlu1 %v429_v5, %s1049_s29 }
 0x11a   : > { %v441_v6 = vpop.f32.mrf.mxu2 }
 0x11b   : > { %467 = vrot.lane.b32.xlu0 %v441_v6, %s1049_s29 }
 0x11c   : > { %v432_v7 = vpop.f32.mrf.mxu0 }
 0x122   : > { %v444_v9 = vpop.f32.mrf.mxu2 }
 0x123   : > { %461 = vrot.lane.b32.xlu0 %v432_v7, %s1049_s29 }
 0x124   : > { %v435_v8 = vpop.f32.mrf.mxu0 }
 0x125   : > { %463 = vrot.lane.b32.xlu2 %v435_v8, %s1049_s29 }
 0x12d   : > { %457 = vrot.lane.b32.xlu2 %v426_v3, %s1049_s29 }
 0x135   : > { %469 = vrot.lane.b32.xlu2 %v444_v9, %s1049_s29 }
 0x16d   : > { %v466_v4 = vpop.permute.xlu1 %465 }
 0x16e   : > { %v484_v10 = vmax.f32 %v438_v1, %v466_v4 }
 0x170   : > { %505 = vrot.lane.b32.xlu0 %v484_v10, %s1050_s30 }
 0x177   : > { %v456_v11 = vpop.permute.xlu0 %455 }
 0x178   : > { %v479_v12 = vmax.f32 %v423_v2, %v456_v11 }
 0x17a   : > { %495 = vrot.lane.b32.xlu2 %v479_v12, %s1050_s30 }
 0x17f   : > { %v464_v13 = vpop.permute.xlu2 %463 }
 0x180   : > { %v1201_v14 = vmax.f32 %v435_v8, %v464_v13 }
 0x182   : > { %503 = vrot.lane.b32.xlu1 %v1201_v14, %s1050_s30 }
 0x187   : > { %v460_v15 = vpop.permute.xlu1 %459  ;;  %v458_v16 = vpop.permute.xlu2 %457 }
 0x188   : > { %v1205_v17 = vmax.f32 %v429_v5, %v460_v15  ;;  %v1207_v18 = vmax.f32 %v426_v3, %v458_v16 }
 0x18a   : > { %497 = vrot.lane.b32.xlu1 %v1207_v18, %s1050_s30  ;;  %499 = vrot.lane.b32.xlu0 %v1205_v17, %s1050_s30 }
 0x18d   : > { %v468_v19 = vpop.permute.xlu0 %467 }
 0x18e   : > { %v485_v20 = vmax.f32 %v441_v6, %v468_v19 }
 0x18f   : > { %v470_v21 = vpop.permute.xlu2 %469 }
 0x190   : > { %v1213_v22 = vmax.f32 %v444_v9, %v470_v21  ;;  %507 = vrot.lane.b32.xlu2 %v485_v20, %s1050_s30 }
 0x192   : > { %509 = vrot.lane.b32.xlu1 %v1213_v22, %s1050_s30 }
 0x195   : > { %v462_v23 = vpop.permute.xlu0 %461 }
 0x196   : > { %v482_v24 = vmax.f32 %v432_v7, %v462_v23 }
 0x198   : > { %501 = vrot.lane.b32.xlu2 %v482_v24, %s1050_s30 }
 0x1d4   : > { %v496_v26 = vpop.permute.xlu2 %495 }
 0x1d5   : > { %v519_v27 = vmax.f32 %v479_v12, %v496_v26 }
 0x1d7   : > { %v531_v28 = vadd.f32 %v1222_v25, %v519_v27 }
 0x1d9   : > { %v539_v29 = vmax.f32 %v531_v28, 0.0 }
 0x1db   : > { %v555_v30 = vrot.slane %v539_v29, 7 }
 0x1dd   : > { %v1226_v31 = vsel %vm571_vm3, 0.0, %v555_v30  ;;  %v580_v32 = vsel %vm571_vm3, %v555_v30, 0.0 }
 0x1de   : > { %v653_v33 = vrot.slane %v1226_v31, 2  ;;  %v654_v34 = vrot.slane %v580_v32, 2  ;;  %v604_v35 = vrot.slane %v1226_v31, 1  ;;  %v605_v36 = vrot.slane %v580_v32, 1 }
 0x1e0   : > { %v655_v37 = vsel %vm652_vm4, %v653_v33, %v654_v34  ;;  %v606_v38 = vsel %vm314_vm0, %v604_v35, %v605_v36 }
 0x1e1   : > { %677 = vrot.lane.b32.xlu0 %v655_v37, %s1050_s30  ;;  %628 = vrot.lane.b32.xlu2 %v606_v38, %s1051_s10 }
 0x1e2   : > { %v506_v39 = vpop.permute.xlu0 %505 }
 0x1e3   : > { %v524_v40 = vmax.f32 %v484_v10, %v506_v39 }
 0x1e5   : > { %v536_v41 = vadd.f32 %v1222_v25, %v524_v40 }
 0x1e7   : > { %v544_v42 = vmax.f32 %v536_v41, 0.0 }
 0x1e9   : > { %v560_v43 = vrot.slane %v544_v42, 7 }
 0x1ea   : > { %v508_v46 = vpop.permute.xlu2 %507 }
 0x1eb   : > { %v1237_v44 = vsel %vm571_vm3, 0.0, %v560_v43  ;;  %v585_v45 = vsel %vm571_vm3, %v560_v43, 0.0  ;;  %v525_v47 = vmax.f32 %v485_v20, %v508_v46 }
 0x1ec   : > { %v668_v48 = vrot.slane %v1237_v44, 2  ;;  %v669_v49 = vrot.slane %v585_v45, 2  ;;  %v619_v50 = vrot.slane %v1237_v44, 1  ;;  %v620_v51 = vrot.slane %v585_v45, 1 }
 0x1ed   : > { %v537_v52 = vadd.f32 %v1222_v25, %v525_v47 }
 0x1ee   : > { %v670_v53 = vsel %vm652_vm4, %v668_v48, %v669_v49  ;;  %v621_v54 = vsel %vm314_vm0, %v619_v50, %v620_v51 }
 0x1ef   : > { %687 = vrot.lane.b32.xlu2 %v670_v53, %s1050_s30  ;;  %v545_v55 = vmax.f32 %v537_v52, 0.0  ;;  %638 = vrot.lane.b32.xlu1 %v621_v54, %s1051_s10 }
 0x1f1   : > { %v561_v56 = vrot.slane %v545_v55, 7 }
 0x1f2   : > { %v502_v62 = vpop.permute.xlu2 %501 }
 0x1f3   : > { %v1248_v57 = vsel %vm571_vm3, 0.0, %v561_v56  ;;  %v1251_v58 = vsel %vm571_vm3, %v561_v56, 0.0  ;;  %v522_v2 = vmax.f32 %v482_v24, %v502_v62 }
 0x1f4   : > { %v504_v59 = vpop.permute.xlu1 %503  ;;  %v622_v60 = vrot.slane %v1248_v57, 1  ;;  %v623_v61 = vrot.slane %v1251_v58, 1  ;;  %v672_v48 = vrot.slane %v1251_v58, 2 }
 0x1f5   : > { %v523_v63 = vmax.f32 %v1201_v14, %v504_v59  ;;  %v534_v6 = vadd.f32 %v1222_v25, %v522_v2 }
 0x1f6   : > { %v624_v0 = vsel %vm314_vm0, %v622_v60, %v623_v61 }
 0x1f7   : > { %v535_v1 = vadd.f32 %v1222_v25, %v523_v63  ;;  %640 = vrot.lane.b32.xlu2 %v624_v0, %s1051_s10  ;;  %v542_v20 = vmax.f32 %v534_v6, 0.0  ;;  %v729_v6 = vld [vmem:[%s1438_s3 + $0x50] sm:$0xff] }
 0x1f9   : > { %v543_v3 = vmax.f32 %v535_v1, 0.0  ;;  %v558_v27 = vrot.slane %v542_v20, 7 }
 0x1fb   : > { %v559_v5 = vrot.slane %v543_v3, 7  ;;  %v1289_v43 = vsel %vm571_vm3, 0.0, %v558_v27  ;;  %v583_v46 = vsel %vm571_vm3, %v558_v27, 0.0 }
 0x1fc   : > { %v498_v7 = vpop.permute.xlu1 %497  ;;  %v500_v8 = vpop.permute.xlu0 %499  ;;  %v613_v49 = vrot.slane %v1289_v43, 1  ;;  %v614_v51 = vrot.slane %v583_v46, 1  ;;  %v662_v2 = vrot.slane %v1289_v43, 2  ;;  %v663_v3 = vrot.slane %v583_v46, 2 }
 0x1fd   : > { %v1261_v9 = vsel %vm571_vm3, 0.0, %v559_v5  ;;  %v584_v4 = vsel %vm571_vm3, %v559_v5, 0.0  ;;  %v520_v10 = vmax.f32 %v1207_v18, %v498_v7  ;;  %v521_v11 = vmax.f32 %v1205_v17, %v500_v8  ;;  %v730_v5 = vld [vmem:[%s1438_s3 + $0x58] sm:$0xff]  ;;  %v728_v7 = vld [vmem:[%s1438_s3 + $0x48] sm:$0xff] }
 0x1fe   : > { %v616_v12 = vrot.slane %v1261_v9, 1  ;;  %v617_v13 = vrot.slane %v584_v4, 1  ;;  %v665_v14 = vrot.slane %v1261_v9, 2  ;;  %v666_v15 = vrot.slane %v584_v4, 2  ;;  %764 = vmatpush.msra.mxu1 %v730_v5  ;;  %1013 = vmatpush.msra.mxu3 %v730_v5  ;;  %v727_v4 = vld [vmem:[%s1438_s3 + $0x40] sm:$0xff]  ;;  %v866_v5 = vld [vmem:[%s1440_s5 + $0x8] sm:$0xff] }
 0x1ff   : > { %v532_v16 = vadd.f32 %v1222_v25, %v520_v10  ;;  %v533_v19 = vadd.f32 %v1222_v25, %v521_v11  ;;  %v615_v59 = vsel %vm314_vm0, %v613_v49, %v614_v51  ;;  %v664_v8 = vsel %vm652_vm4, %v662_v2, %v663_v3  ;;  %v726_v10 = vld [vmem:[%s1438_s3 + $0x38] sm:$0xff]  ;;  %v725_v11 = vld [vmem:[%s1438_s3 + $0x30] sm:$0xff] }
 0x200   : > { %v618_v21 = vsel %vm314_vm0, %v616_v12, %v617_v13  ;;  %v667_v23 = vsel %vm652_vm4, %v665_v14, %v666_v15  ;;  %765 = vmatpush.msra.mxu1 %v729_v6  ;;  %1014 = vmatpush.msra.mxu3 %v729_v6  ;;  %v724_v12 = vld [vmem:[%s1438_s3 + $0x28] sm:$0xff]  ;;  %v723_v13 = vld [vmem:[%s1438_s3 + $0x20] sm:$0xff]  ;;  %v722_v14 = vld [vmem:[%s1438_s3 + $0x18] sm:$0xff] }
 0x201   : > { %v540_v24 = vmax.f32 %v532_v16, 0.0  ;;  %v541_v26 = vmax.f32 %v533_v19, 0.0  ;;  %636 = vrot.lane.b32.xlu0 %v618_v21, %s1051_s10  ;;  %685 = vrot.lane.b32.xlu1 %v667_v23, %s1050_s30  ;;  %v721_v15 = vld [vmem:[%s1438_s3 + $0x10] sm:$0xff]  ;;  %v720_v16 = vld [vmem:[%s1438_s3 + $0x8] sm:$0xff] }
 0x202   : > { %766 = vmatpush.msra.mxu1 %v728_v7  ;;  %1015 = vmatpush.msra.mxu3 %v728_v7  ;;  %v719_v19 = vld [vmem:[%s1438_s3] sm:$0xff] }
 0x203   : > { %v556_v17 = vrot.slane %v540_v24, 7  ;;  %v557_v18 = vrot.slane %v541_v26, 7 }
 0x204   : > { %v510_v28 = vpop.permute.xlu1 %509  ;;  %767 = vmatpush.msra.mxu1 %v727_v4  ;;  %1016 = vmatpush.msra.mxu3 %v727_v4 }
 0x205   : > { %v1275_v29 = vsel %vm571_vm3, 0.0, %v556_v17  ;;  %v581_v30 = vsel %vm571_vm3, %v556_v17, 0.0  ;;  %v1279_v32 = vsel %vm571_vm3, 0.0, %v557_v18  ;;  %v582_v33 = vsel %vm571_vm3, %v557_v18, 0.0 }
 0x206   : > { %v526_v34 = vmax.f32 %v1213_v22, %v510_v28  ;;  %v607_v35 = vrot.slane %v1275_v29, 1  ;;  %v608_v36 = vrot.slane %v581_v30, 1  ;;  %v656_v37 = vrot.slane %v1275_v29, 2  ;;  %768 = vmatpush.msra.mxu1 %v726_v10  ;;  %1017 = vmatpush.msra.mxu3 %v726_v10 }
 0x207   : > { %v657_v38 = vrot.slane %v581_v30, 2  ;;  %v659_v39 = vrot.slane %v1279_v32, 2  ;;  %v660_v40 = vrot.slane %v582_v33, 2  ;;  %v610_v52 = vrot.slane %v1279_v32, 1 }
 0x208   : > { %v538_v41 = vadd.f32 %v1222_v25, %v526_v34  ;;  %v609_v42 = vsel %vm314_vm0, %v607_v35, %v608_v36  ;;  %v671_v25 = vrot.slane %v1248_v57, 2  ;;  %v611_v53 = vrot.slane %v582_v33, 1  ;;  %769 = vmatpush.msra.mxu1 %v725_v11  ;;  %1018 = vmatpush.msra.mxu3 %v725_v11 }
 0x209   : > { %630 = vrot.lane.b32.xlu0 %v609_v42, %s1051_s10  ;;  %v658_v22 = vsel %vm652_vm4, %v656_v37, %v657_v38  ;;  %v661_v45 = vsel %vm652_vm4, %v659_v39, %v660_v40 }
 0x20a   : > { %v546_v47 = vmax.f32 %v538_v41, 0.0  ;;  %679 = vrot.lane.b32.xlu1 %v658_v22, %s1050_s30  ;;  %681 = vrot.lane.b32.xlu2 %v661_v45, %s1050_s30  ;;  %v673_v54 = vsel %vm652_vm4, %v671_v25, %v672_v48  ;;  %v612_v58 = vsel %vm314_vm0, %v610_v52, %v611_v53  ;;  %v872_v52 = vld [vmem:[%s1440_s5 + $0x38] sm:$0xff]  ;;  %v1038_v53 = vld [vmem:[%s1439_s4] ss:$0 sm:$0xff] }
 0x20b   : > { %770 = vmatpush.msra.mxu1 %v724_v12  ;;  %1019 = vmatpush.msra.mxu3 %v724_v12 }
 0x20c   : > { %v562_v50 = vrot.slane %v546_v47, 7  ;;  %909 = vmatpush.msrb.mxu2 %v872_v52 }
 0x20d   : > { %771 = vmatpush.msra.mxu1 %v723_v13  ;;  %1020 = vmatpush.msra.mxu3 %v723_v13 }
 0x20e   : > { %v1303_v55 = vsel %vm571_vm3, 0.0, %v562_v50  ;;  %v587_v56 = vsel %vm571_vm3, %v562_v50, 0.0 }
 0x20f   : > { %v625_v60 = vrot.slane %v1303_v55, 1  ;;  %v626_v61 = vrot.slane %v587_v56, 1  ;;  %v674_v62 = vrot.slane %v1303_v55, 2  ;;  %v675_v63 = vrot.slane %v587_v56, 2  ;;  %772 = vmatpush.msra.mxu1 %v722_v14  ;;  %1021 = vmatpush.msra.mxu3 %v722_v14 }
 0x211   : > { %689 = vrot.lane.b32.xlu0 %v673_v54, %s1050_s30  ;;  %v627_v0 = vsel %vm314_vm0, %v625_v60, %v626_v61  ;;  %v676_v1 = vsel %vm652_vm4, %v674_v62, %v675_v63  ;;  %773 = vmatpush.msra.mxu1 %v721_v15  ;;  %v868_v60 = vld [vmem:[%s1440_s5 + $0x18] sm:$0xff]  ;;  %v867_v62 = vld [vmem:[%s1440_s5 + $0x10] sm:$0xff] }
 0x212   : > { %634 = vrot.lane.b32.xlu2 %v615_v59, %s1051_s10  ;;  %632 = vrot.lane.b32.xlu1 %v612_v58, %s1051_s10  ;;  %v869_v58 = vld [vmem:[%s1440_s5 + $0x20] sm:$0xff] }
 0x213   : > { %1022 = vmatpush.msra.mxu3 %v721_v15  ;;  %774 = vmatpush.msra.mxu1 %v720_v16 }
 0x215   : > { %1023 = vmatpush.msra.mxu3 %v720_v16  ;;  %775 = vmatpush.msra.mxu1 %v719_v19 }
 0x217   : > { %1024 = vmatpush.msra.mxu3 %v719_v19 }
 0x219   : > { %642 = vrot.lane.b32.xlu0 %v627_v0, %s1051_s10 }
 0x21a   : > { %691 = vrot.lane.b32.xlu1 %v676_v1, %s1050_s30 }
 0x221   : > { %683 = vrot.lane.b32.xlu0 %v664_v8, %s1050_s30  ;;  %v865_v8 = vld [vmem:[%s1440_s5] sm:$0xff] }
 0x23b   : > { %v629_v20 = vpop.permute.xlu2 %628 }
 0x23c   : > { %v702_v21 = vsel %vm701_vm5, %v1226_v31, %v629_v20 }
 0x249   : > { %v688_v17 = vpop.permute.xlu2 %687 }
 0x251   : > { %v641_v36 = vpop.permute.xlu2 %640 }
 0x253   : > { %v678_v23 = vpop.permute.xlu0 %677 }
 0x254   : > { %v711_v24 = vsel %vm710_vm6, %v702_v21, %v678_v23 }
 0x255   : > { %992 = vmatmul.msk.f32.vlgmr.msra.gmra.mxu1 %vm735_vm7, %v711_v24 }
 0x261   : > { %v639_v26 = vpop.permute.xlu1 %638 }
 0x262   : > { %v707_v33 = vsel %vm701_vm5, %v1237_v44, %v639_v26 }
 0x263   : > { %v716_v38 = vsel %vm710_vm6, %v707_v33, %v688_v17 }
 0x264   : > { %v682_v41 = vpop.permute.xlu2 %681 }
 0x26c   : > { %v635_v47 = vpop.permute.xlu2 %634 }
 0x26d   : > { %v705_v25 = vsel %vm701_vm5, %v1289_v43, %v635_v47  ;;  %v871_v43 = vld [vmem:[%s1440_s5 + $0x30] sm:$0xff] }
 0x26e   : > { %910 = vmatpush.msrb.mxu2 %v871_v43 }
 0x273   : > { %v686_v18 = vpop.permute.xlu1 %685  ;;  %v637_v27 = vpop.permute.xlu0 %636 }
 0x274   : > { %v706_v28 = vsel %vm701_vm5, %v1261_v9, %v637_v27  ;;  %v708_v9 = vsel %vm701_vm5, %v1248_v57, %v641_v36 }
 0x275   : > { %v715_v30 = vsel %vm710_vm6, %v706_v28, %v686_v18 }
 0x276   : > { %996 = vmatmul.msk.f32.vlgmr.msra.gmra.mxu3 %vm735_vm7, %v715_v30 }
 0x27b   : > { %v631_v31 = vpop.permute.xlu0 %630 }
 0x27c   : > { %v680_v34 = vpop.permute.xlu1 %679  ;;  %v703_v35 = vsel %vm701_vm5, %v1275_v29, %v631_v31 }
 0x27d   : > { %v712_v37 = vsel %vm710_vm6, %v703_v35, %v680_v34 }
 0x27e   : > { %993 = vmatmul.msk.f32.gmra.mxu1 %vm735_vm7, %v712_v37  ;;  %997 = vmatmul.msk.f32.gmra.mxu3 %vm735_vm7, %v716_v38 }
 0x283   : > { %v690_v39 = vpop.permute.xlu0 %689 }
 0x284   : > { %v633_v40 = vpop.permute.xlu1 %632  ;;  %v717_v44 = vsel %vm710_vm6, %v708_v9, %v690_v39 }
 0x285   : > { %v704_v29 = vsel %vm701_vm5, %v1279_v32, %v633_v40 }
 0x286   : > { %v713_v42 = vsel %vm710_vm6, %v704_v29, %v682_v41  ;;  %998 = vmatmul.msk.f32.gmra.mxu3 %vm735_vm7, %v717_v44 }
 0x287   : > { %994 = vmatmul.msk.f32.gmra.mxu1 %vm735_vm7, %v713_v42 }
 0x28b   : > { %v643_v22 = vpop.permute.xlu0 %642 }
 0x28c   : > { %v692_v45 = vpop.permute.xlu1 %691  ;;  %v709_v46 = vsel %vm701_vm5, %v1303_v55, %v643_v22  ;;  %v870_v55 = vld [vmem:[%s1440_s5 + $0x28] sm:$0xff] }
 0x28d   : > { %v718_v57 = vsel %vm710_vm6, %v709_v46, %v692_v45  ;;  %911 = vmatpush.msrb.mxu2 %v870_v55 }
 0x28e   : > { %999 = vmatmul.msk.f32.gmra.mxu3 %vm735_vm7, %v718_v57 }
 0x28f   : > { %912 = vmatpush.msrb.mxu2 %v869_v58 }
 0x291   : > { %913 = vmatpush.msrb.mxu2 %v868_v60 }
 0x293   : > { %v684_v32 = vpop.permute.xlu0 %683  ;;  %914 = vmatpush.msrb.mxu2 %v867_v62 }
 0x294   : > { %v714_v48 = vsel %vm710_vm6, %v705_v25, %v684_v32 }
 0x295   : > { %995 = vmatmul.msk.f32.gmra.mxu1 %vm735_vm7, %v714_v48  ;;  %915 = vmatpush.msrb.mxu2 %v866_v5 }
 0x297   : > { %916 = vmatpush.msrb.mxu2 %v865_v8 }
 0x2d2   : > { %v777_v49 = vpop.f32.mrf.mxu1 }
 0x2d3   : > { %v778_v56 = vadd.f32 %v1038_v53, %v777_v49 }
 0x2d5   : > { %v801_v1 = vmax.f32 %v778_v56, 0.0 }
 0x2d7   : > { %v809_v10 = vsel %vm710_vm6, %v801_v1, 0.0 }
 0x2d8   : > { %v810_v19 = vrot.slane %v809_v10, 4 }
 0x2da   : > { %v811_v27 = vadd.f32 %v810_v19, %v809_v10 }
 0x2dc   : > { %v812_v9 = vrot.slane %v811_v27, 2 }
 0x2de   : > { %v813_v47 = vadd.f32 %v812_v9, %v811_v27 }
 0x2f9   : > { %v789_v50 = vpop.f32.mrf.mxu3 }
 0x2fa   : > { %v790_v63 = vadd.f32 %v1038_v53, %v789_v50 }
 0x2fb   : > { %v780_v51 = vpop.f32.mrf.mxu1 }
 0x2fc   : > { %v781_v54 = vadd.f32 %v1038_v53, %v780_v51  ;;  %v805_v4 = vmax.f32 %v790_v63, 0.0 }
 0x2fe   : > { %v802_v61 = vmax.f32 %v781_v54, 0.0  ;;  %v837_v20 = vsel %vm710_vm6, %v805_v4, 0.0  ;;  %v814_v54 = vrot.slane %v813_v47, 1 }
 0x2ff   : > { %v838_v17 = vrot.slane %v837_v20, 4 }
 0x300   : > { %v816_v6 = vsel %vm710_vm6, %v802_v61, 0.0 }
 0x301   : > { %v792_v59 = vpop.f32.mrf.mxu3  ;;  %v817_v14 = vrot.slane %v816_v6, 4  ;;  %v839_v36 = vadd.f32 %v838_v17, %v837_v20  ;;  %v1039_v20 = vld [vmem:[%s1441_s6] ss:$0 sm:$0xff] }
 0x302   : > { %v793_v2 = vadd.f32 %v1038_v53, %v792_v59 }
 0x303   : > { %v818_v24 = vadd.f32 %v817_v14, %v816_v6  ;;  %v840_v22 = vrot.slane %v839_v36, 2 }
 0x304   : > { %v783_v0 = vpop.f32.mrf.mxu1  ;;  %v806_v11 = vmax.f32 %v793_v2, 0.0 }
 0x305   : > { %v784_v3 = vadd.f32 %v1038_v53, %v783_v0  ;;  %v819_v31 = vrot.slane %v818_v24, 2  ;;  %v841_v52 = vadd.f32 %v840_v22, %v839_v36  ;;  %v815_v0 = vadd.f32 %v814_v54, %v813_v47 }
 0x306   : > { %v844_v23 = vsel %vm710_vm6, %v806_v11, 0.0 }
 0x307   : > { %v803_v7 = vmax.f32 %v784_v3, 0.0  ;;  %v845_v28 = vrot.slane %v844_v23, 4  ;;  %v820_v29 = vadd.f32 %v819_v31, %v818_v24  ;;  %v842_v62 = vrot.slane %v841_v52, 1 }
 0x309   : > { %v823_v12 = vsel %vm710_vm6, %v803_v7, 0.0  ;;  %v795_v13 = vpop.f32.mrf.mxu3  ;;  %v846_v39 = vadd.f32 %v845_v28, %v844_v23  ;;  %v821_v50 = vrot.slane %v820_v29, 1  ;;  %v843_v8 = vadd.f32 %v842_v62, %v841_v52 }
 0x30a   : > { %v796_v15 = vadd.f32 %v1038_v53, %v795_v13  ;;  %v824_v16 = vrot.slane %v823_v12, 4 }
 0x30b   : > { %v847_v25 = vrot.slane %v846_v39, 2  ;;  %v822_v58 = vadd.f32 %v821_v50, %v820_v29 }
 0x30c   : > { %v807_v21 = vmax.f32 %v796_v15, 0.0  ;;  %v825_v18 = vadd.f32 %v824_v16, %v823_v12 }
 0x30d   : > { %v848_v55 = vadd.f32 %v847_v25, %v846_v39  ;;  %v886_v5 = vsel %vm885_vm8, %v822_v58, %v815_v0 }
 0x30e   : > { %v851_v26 = vsel %vm710_vm6, %v807_v21, 0.0  ;;  %v826_v37 = vrot.slane %v825_v18, 2 }
 0x30f   : > { %v852_v30 = vrot.slane %v851_v26, 4  ;;  %v849_v1 = vrot.slane %v848_v55, 1 }
 0x310   : > { %v827_v45 = vadd.f32 %v826_v37, %v825_v18 }
 0x311   : > { %v798_v33 = vpop.f32.mrf.mxu3  ;;  %v853_v44 = vadd.f32 %v852_v30, %v851_v26  ;;  %v850_v10 = vadd.f32 %v849_v1, %v848_v55 }
 0x312   : > { %v799_v34 = vadd.f32 %v1038_v53, %v798_v33  ;;  %v786_v35 = vpop.f32.mrf.mxu1 }
 0x313   : > { %v787_v38 = vadd.f32 %v1038_v53, %v786_v35  ;;  %v854_v48 = vrot.slane %v853_v44, 2  ;;  %v828_v53 = vrot.slane %v827_v45, 1 }
 0x314   : > { %v808_v40 = vmax.f32 %v799_v34, 0.0 }
 0x315   : > { %v804_v41 = vmax.f32 %v787_v38, 0.0  ;;  %v855_v59 = vadd.f32 %v854_v48, %v853_v44  ;;  %v829_v63 = vadd.f32 %v828_v53, %v827_v45 }
 0x316   : > { %v858_v42 = vsel %vm710_vm6, %v808_v40, 0.0 }
 0x317   : > { %v859_v46 = vrot.slane %v858_v42, 4  ;;  %v830_v57 = vsel %vm710_vm6, %v804_v41, 0.0  ;;  %v856_v3 = vrot.slane %v855_v59, 1  ;;  %v888_v4 = vsel %vm887_vm9, %v829_v63, %v886_v5 }
 0x318   : > { %v831_v32 = vrot.slane %v830_v57, 4 }
 0x319   : > { %v860_v49 = vadd.f32 %v859_v46, %v858_v42  ;;  %v857_v12 = vadd.f32 %v856_v3, %v855_v59 }
 0x31a   : > { %v832_v51 = vadd.f32 %v831_v32, %v830_v57 }
 0x31b   : > { %v861_v43 = vrot.slane %v860_v49, 2 }
 0x31c   : > { %v833_v56 = vrot.slane %v832_v51, 2 }
 0x31d   : > { %v862_v60 = vadd.f32 %v861_v43, %v860_v49 }
 0x31e   : > { %v834_v61 = vadd.f32 %v833_v56, %v832_v51 }
 0x31f   : > { %v863_v6 = vrot.slane %v862_v60, 1 }
 0x320   : > { %v835_v2 = vrot.slane %v834_v61, 1 }
 0x321   : > { %v864_v14 = vadd.f32 %v863_v6, %v862_v60 }
 0x322   : > { %v836_v7 = vadd.f32 %v835_v2, %v834_v61 }
 0x324   : > { %v890_v11 = vsel %vm889_vm10, %v836_v7, %v888_v4 }
 0x325   : > { %v892_v13 = vsel %vm891_vm11, %v843_v8, %v890_v11 }
 0x326   : > { %v894_v15 = vsel %vm893_vm12, %v850_v10, %v892_v13 }
 0x327   : > { %v896_v16 = vsel %vm895_vm13, %v857_v12, %v894_v15 }
 0x328   : > { %v898_v19 = vsel %vm897_vm14, %v864_v14, %v896_v16 }
 0x329   : > { %1000 = vmatmul.msk.f32.vlgmr.msrb.gmra.mxu2 %vm710_vm6, %v898_v19 }
 0x3ac   : > { %v918_v21 = vpop.f32.mrf.mxu2 }
 0x3ad   : > { %v919_v23 = vadd.f32 %v1039_v20, %v918_v21 }
 0x3af   : > { %921 = vst [vmem:[%s281_s16] sm:$0xff] %v919_v23 }
 0x3b0 PF: > { %s17_s24 = sadd.s32 1, %s1046_s24  }
 0x3b1   : > { %p14_p5 = scmp.ge.s32.totalorder %s17_s24, 4  }
 0x3b3   :  { %16 = sbr.rel (!%p14_p5) target bundleno = 1 (0x1), region = 78 }

</bundles_post_ra>
